<compile_context>
chip_gen: v7x
topology: tpu7x:2x2x1
jax: 0.10.0
libtpu: 0.0.40
codegen_flags: <defaults>
</compile_context>

<pallas_src>
import functools

import jax
import jax.numpy as jnp
from jax import lax
from jax.experimental import pallas as pl
from jax.experimental.pallas import tpu as pltpu


def _round_up(x, m):
    return (x + m - 1) // m * m


def _cdiv(a, b):
    return (a + b - 1) // b


def _bilinear_disc_kernel(hu_ref, ha_ref, halo_ref, w_ref, b_ref, out_ref, *,
                          negsamp_round, halo_rows):
    """One node-tile of the bilinear patch discriminator.

    hu_ref   : (tm, H)              h_unano tile (left bilinear operand)
    ha_ref   : (tm, H)              h_ano tile (un-shifted right operand)
    halo_ref : (num_tiles, HALO, H) resident table; block i holds the HALO rows
                                    of the extended h_ano preceding tile i
    w_ref    : (H, H)               bilinear weight, resident
    b_ref    : (1, 1)               bilinear bias, SMEM
    out_ref  : (tm, R)              per-node score for every round
    """
    R = negsamp_round + 1
    HALO = halo_rows
    tm = ha_ref.shape[0]
    i = pl.program_id(0)
    f32 = jnp.float32

    hu = hu_ref[...].astype(f32)
    ha = ha_ref[...].astype(f32)
    halo = halo_ref[i].astype(f32)                          # (HALO, H)
    bias = b_ref[0, 0]

    # One MXU matmul shared by every round.
    t = jnp.dot(hu, w_ref[...], preferred_element_type=f32)  # (tm, H)
    t_head = t[:HALO, :]                                      # aligned slice
    row_idx = lax.broadcasted_iota(jnp.int32, (HALO, 1), 0)

    cols = []
    for r in range(R):                     # R is tiny -> static unroll
        if r == 0:
            col = jnp.sum(t * ha, axis=-1, keepdims=True)
        else:
            # rows j >= r: operand is ha[j - r]   (XLU sublane roll, no copies)
            shifted = pltpu.roll(ha, shift=r, axis=0)
            col = jnp.sum(t * shifted, axis=-1, keepdims=True)
            # rows j < r: operand comes from the halo rows preceding this tile
            halo_shift = pltpu.roll(halo, shift=r, axis=0)
            corr = jnp.sum(t_head * halo_shift, axis=-1, keepdims=True)
            head = jnp.where(row_idx < r, corr, col[:HALO, :])
            if tm > HALO:
                col = jnp.concatenate([head, col[HALO:, :]], axis=0)
            else:
                col = head
        cols.append(col + bias)

    out_ref[...] = jnp.concatenate(cols, axis=-1).astype(out_ref.dtype)


def patch_discriminator_forward(h_ano, h_unano, weight, bias, negsamp_round, *,
                                target_block_bytes=1 << 20, block_rows=None):
    """Pallas equivalent of Patch_Discriminator.forward(h_ano, h_unano)."""
    N, H = h_ano.shape
    assert h_unano.shape == (N, H)
    R = negsamp_round + 1
    rmax = negsamp_round
    assert N >= rmax + 1, "need at least negsamp_round + 1 nodes"

    HALO = _round_up(max(rmax, 1), 8)          # halo rows per tile (>= rmax)
    itemsize = jnp.dtype(h_ano.dtype).itemsize

    # ---- node-tile size: sized in bytes (~1 MiB per streamed input block) ---
    if block_rows is None:
        tm = _round_up(max(target_block_bytes // (H * itemsize), 8), 8)
    else:
        tm = _round_up(max(block_rows, 8), 8)
    tm = min(tm, _round_up(N, 8))
    # v7x: keep >= ~4 grid steps (both TensorCores busy) as long as each
    # streamed block would still be >= 512 KiB.
    quarter = _round_up(_cdiv(N, 4), 8)
    if quarter * H * itemsize >= (512 << 10):
        tm = min(tm, quarter)
    tm = max(tm, HALO)

    def _vmem_bytes(t):
        nt = _cdiv(N, t)
        return (2 * 2 * t * H * itemsize       # hu + ha, double-buffered
                + 2 * t * R * 4                # output, double-buffered
                + H * H * 4                    # resident weight
                + nt * HALO * H * itemsize)    # resident halo table

    # Conservative cap keeps double-buffering inside v5e's 16 MiB scoped VMEM
    # and far below v7x's 64 MiB physical VMEM.
    while tm > HALO and _vmem_bytes(tm) > (12 << 20):
        tm = max(_round_up(tm // 2, 8), HALO)

    num_tiles = _cdiv(N, tm)
    vmem_limit = int(min(max(2 * _vmem_bytes(tm), 16 << 20), 64 << 20))

    # ---- tiny per-tile halo table (rows of h_ext preceding each tile) -------
    # h_ext = concat([h_ano[N-1-rmax : N-1], h_ano]); round r's operand is
    # h_ext shifted down by r rows, so tile i only ever needs the HALO rows of
    # h_ext immediately preceding its own rows.
    halo0 = jnp.zeros((HALO, H), h_ano.dtype)
    if rmax > 0:
        halo0 = halo0.at[HALO - rmax:, :].set(h_ano[N - 1 - rmax:N - 1, :])
    if num_tiles > 1:
        starts = jnp.arange(1, num_tiles) * tm - HALO          # all >= 0
        idx = starts[:, None] + jnp.arange(HALO)[None, :]
        halo = jnp.concatenate([halo0[None], h_ano[idx]], axis=0)
    else:
        halo = halo0[None]

    kernel = functools.partial(_bilinear_disc_kernel,
                               negsamp_round=negsamp_round, halo_rows=HALO)

    out = pl.pallas_call(
        kernel,
        out_shape=jax.ShapeDtypeStruct((N, R), jnp.float32),
        grid_spec=pltpu.PrefetchScalarGridSpec(
            num_scalar_prefetch=0,
            grid=(num_tiles,),
            in_specs=[
                pl.BlockSpec((tm, H), lambda i: (i, 0)),                   # h_unano
                pl.BlockSpec((tm, H), lambda i: (i, 0)),                   # h_ano
                pl.BlockSpec((num_tiles, HALO, H), lambda i: (0, 0, 0)),   # halo (resident)
                pl.BlockSpec((H, H), lambda i: (0, 0)),                    # weight (resident)
                pl.BlockSpec(memory_space=pltpu.MemorySpace.SMEM),         # bias
            ],
            out_specs=pl.BlockSpec((tm, R), lambda i: (i, 0)),
        ),
        compiler_params=pltpu.CompilerParams(
            dimension_semantics=("parallel",),
            vmem_limit_bytes=vmem_limit,
        ),
    )(h_unano, h_ano, halo,
      weight.astype(jnp.float32).reshape(H, H),
      bias.astype(jnp.float32).reshape(1, 1))

    # torch.cat(scs): rows [r*N : (r+1)*N] hold round r's (N, 1) scores.
    return out.T.reshape(R * N, 1)


if __name__ == "__main__":
    key = jax.random.PRNGKey(0)
    n_h = 32

    def make_inputs(k, n):
        k1, k2, k3 = jax.random.split(k, 3)
        h_ano = jax.random.normal(k1, (n, n_h), jnp.float32)
        h_unano = jax.random.normal(k2, (n, n_h), jnp.float32)
        # nn.Bilinear(n_h, n_h, 1): weight (1, n_h, n_h) xavier_uniform, bias 0.
        fan_in, fan_out = n_h * n_h, n_h
        bound = (6.0 / (fan_in + fan_out)) ** 0.5
        weight = jax.random.uniform(k3, (n_h, n_h), jnp.float32, -bound, bound)
        bias = jnp.zeros((1,), jnp.float32)
        return h_ano, h_unano, weight, bias

    def reference(h_ano, h_unano, weight, bias, negsamp_round):
        hi = lax.Precision.HIGHEST

        def fk(x1, x2):
            return jnp.sum(jnp.dot(x1, weight, precision=hi) * x2,
                           axis=-1, keepdims=True) + bias

        scs = [fk(h_unano, h_ano)]
        h_mi = h_ano
        for _ in range(negsamp_round):
            h_mi = jnp.concatenate([h_mi[-2:-1, :], h_mi[:-1, :]], axis=0)
            scs.append(fk(h_unano, h_mi))
        return jnp.concatenate(scs, axis=0)

    # (N, negsamp_round, forced block_rows) - covers the single-tile path, a
    # multi-tile grid with a ragged last tile, and the tm == HALO edge case.
    cases = [
        (8, 2, None),      # small, one tile
        (39, 2, 16),       # 3 tiles, ragged last tile, multi-tile halos
        (20, 3, 8),        # tm == HALO, ragged last tile
    ]
    k = key
    for n, nsr, br in cases:
        k, sub = jax.random.split(k)
        h_ano, h_unano, weight, bias = make_inputs(sub, n)
        out = patch_discriminator_forward(h_ano, h_unano, weight, bias, nsr,
                                          block_rows=br)
        out = jax.block_until_ready(out)
        ref = reference(h_ano, h_unano, weight, bias, nsr)
        assert out.shape == ((nsr + 1) * n, 1), out.shape
        assert jnp.allclose(out, ref, atol=2e-2, rtol=2e-2), (
            f"mismatch for case {(n, nsr, br)}: "
            f"max abs err {jnp.max(jnp.abs(out - ref))}")

    print("KERNEL_OK")
</pallas_src>

<mosaic_0001>
module attributes {stable_mosaic.version = 11 : i64} {
  func.func @_bilinear_disc_kernel(%arg0: i32, %arg1: memref<8x32xf32, #tpu.memory_space<vmem>>, %arg2: memref<8x32xf32, #tpu.memory_space<vmem>>, %arg3: memref<1x8x32xf32, #tpu.memory_space<vmem>>, %arg4: memref<32x32xf32, #tpu.memory_space<vmem>>, %arg5: memref<1x1xf32, #tpu.memory_space<smem>>, %arg6: memref<8x3xf32, #tpu.memory_space<vmem>>) attributes {dimension_semantics = [#tpu.dimension_semantics<parallel>], iteration_bounds = array<i64: 1>, scalar_prefetch = 0 : i64, scratch_operands = 0 : i64, tpu.core_type = #tpu.core_type<tc>, window_params = [{transform_indices = @transform_0, window_bounds = array<i64: 8, 32>}, {transform_indices = @transform_1, window_bounds = array<i64: 8, 32>}, {pipeline_mode = #tpu.pipeline_mode<synchronous>, transform_indices = @transform_2, window_bounds = array<i64: 1, 8, 32>}, {pipeline_mode = #tpu.pipeline_mode<synchronous>, transform_indices = @transform_3, window_bounds = array<i64: 32, 32>}, {transform_indices = @transform_4, window_bounds = array<i64: 1, 1>}, {transform_indices = @transform_5, window_bounds = array<i64: 8, 3>}]} {
    %c0 = arith.constant 0 : index
    %c0_0 = arith.constant 0 : index
    %0 = vector.load %arg1[%c0, %c0_0] : memref<8x32xf32, #tpu.memory_space<vmem>>, vector<8x32xf32>
    %c0_1 = arith.constant 0 : index
    %c0_2 = arith.constant 0 : index
    %1 = vector.load %arg2[%c0_1, %c0_2] : memref<8x32xf32, #tpu.memory_space<vmem>>, vector<8x32xf32>
    %2 = arith.index_cast %arg0 : i32 to index
    %c0_3 = arith.constant 0 : index
    %c0_4 = arith.constant 0 : index
    %3 = vector.load %arg3[%2, %c0_3, %c0_4] : memref<1x8x32xf32, #tpu.memory_space<vmem>>, vector<1x8x32xf32>
    %4 = vector.shape_cast %3 : vector<1x8x32xf32> to vector<8x32xf32>
    %c0_5 = arith.constant 0 : index
    %c0_6 = arith.constant 0 : index
    %5 = memref.load %arg5[%c0_5, %c0_6] : memref<1x1xf32, #tpu.memory_space<smem>>
    %c0_7 = arith.constant 0 : index
    %c0_8 = arith.constant 0 : index
    %6 = vector.load %arg4[%c0_7, %c0_8] : memref<32x32xf32, #tpu.memory_space<vmem>>, vector<32x32xf32>
    %cst = arith.constant dense<0.000000e+00> : vector<8x32xf32>
    %7 = tpu.matmul %0, %6, %cst {dimension_numbers = #tpu.dot_dimension_numbers<[1], [0], [0], [1], [0, 0, 1, 1], [], []>} : vector<8x32xf32>, vector<32x32xf32>, vector<8x32xf32> -> vector<8x32xf32>
    %8 = tpu.iota {dimensions = array<i32: 0>} : vector<8x1xi32>
    %9 = arith.mulf %7, %1 : vector<8x32xf32>
    %cst_9 = arith.constant dense<0.000000e+00> : vector<8xf32>
    %10 = vector.multi_reduction <add>, %9, %cst_9 [1] : vector<8x32xf32> to vector<8xf32>
    %11 = vector.shape_cast %10 : vector<8xf32> to vector<8x1xf32>
    %12 = vector.broadcast %5 : f32 to vector<8x1xf32>
    %13 = arith.addf %11, %12 : vector<8x1xf32>
    %c1_i32 = arith.constant 1 : i32
    %14 = tpu.dynamic_rotate %1 by %c1_i32 dim 0 : vector<8x32xf32>, i32 -> vector<8x32xf32>
    %15 = arith.mulf %7, %14 : vector<8x32xf32>
    %cst_10 = arith.constant dense<0.000000e+00> : vector<8xf32>
    %16 = vector.multi_reduction <add>, %15, %cst_10 [1] : vector<8x32xf32> to vector<8xf32>
    %17 = vector.shape_cast %16 : vector<8xf32> to vector<8x1xf32>
    %c1_i32_11 = arith.constant 1 : i32
    %18 = tpu.dynamic_rotate %4 by %c1_i32_11 dim 0 : vector<8x32xf32>, i32 -> vector<8x32xf32>
    %19 = arith.mulf %7, %18 : vector<8x32xf32>
    %cst_12 = arith.constant dense<0.000000e+00> : vector<8xf32>
    %20 = vector.multi_reduction <add>, %19, %cst_12 [1] : vector<8x32xf32> to vector<8xf32>
    %21 = vector.shape_cast %20 : vector<8xf32> to vector<8x1xf32>
    %c1_i32_13 = arith.constant 1 : i32
    %22 = vector.broadcast %c1_i32_13 : i32 to vector<8x1xi32>
    %23 = arith.cmpi slt, %8, %22 : vector<8x1xi32>
    %24 = arith.select %23, %21, %17 : vector<8x1xi1>, vector<8x1xf32>
    %25 = vector.broadcast %5 : f32 to vector<8x1xf32>
    %26 = arith.addf %24, %25 : vector<8x1xf32>
    %c2_i32 = arith.constant 2 : i32
    %27 = tpu.dynamic_rotate %1 by %c2_i32 dim 0 : vector<8x32xf32>, i32 -> vector<8x32xf32>
    %28 = arith.mulf %7, %27 : vector<8x32xf32>
    %cst_14 = arith.constant dense<0.000000e+00> : vector<8xf32>
    %29 = vector.multi_reduction <add>, %28, %cst_14 [1] : vector<8x32xf32> to vector<8xf32>
    %30 = vector.shape_cast %29 : vector<8xf32> to vector<8x1xf32>
    %c2_i32_15 = arith.constant 2 : i32
    %31 = tpu.dynamic_rotate %4 by %c2_i32_15 dim 0 : vector<8x32xf32>, i32 -> vector<8x32xf32>
    %32 = arith.mulf %7, %31 : vector<8x32xf32>
    %cst_16 = arith.constant dense<0.000000e+00> : vector<8xf32>
    %33 = vector.multi_reduction <add>, %32, %cst_16 [1] : vector<8x32xf32> to vector<8xf32>
    %34 = vector.shape_cast %33 : vector<8xf32> to vector<8x1xf32>
    %c2_i32_17 = arith.constant 2 : i32
    %35 = vector.broadcast %c2_i32_17 : i32 to vector<8x1xi32>
    %36 = arith.cmpi slt, %8, %35 : vector<8x1xi32>
    %37 = arith.select %36, %34, %30 : vector<8x1xi1>, vector<8x1xf32>
    %38 = vector.broadcast %5 : f32 to vector<8x1xf32>
    %39 = arith.addf %37, %38 : vector<8x1xf32>
    %40 = tpu.concatenate %13, %26, %39 in 1 : vector<8x1xf32>, vector<8x1xf32>, vector<8x1xf32> -> vector<8x3xf32>
    %c0_18 = arith.constant 0 : index
    %c0_19 = arith.constant 0 : index
    %41 = vector.load %arg6[%c0_18, %c0_19] : memref<8x3xf32, #tpu.memory_space<vmem>>, vector<8x3xf32>
    tpu.vector_store %arg6[%c0_18, %c0_19], %40 {strides = array<i32>} : memref<8x3xf32, #tpu.memory_space<vmem>>, vector<8x3xf32>,
    return
  }
  func.func @transform_0(%arg0: i32) -> (i32, i32) {
    %c0_i32 = arith.constant 0 : i32
    %c0_i32_0 = arith.constant 0 : i32
    return %arg0, %c0_i32 : i32, i32
  }
  func.func @transform_1(%arg0: i32) -> (i32, i32) {
    %c0_i32 = arith.constant 0 : i32
    %c0_i32_0 = arith.constant 0 : i32
    return %arg0, %c0_i32 : i32, i32
  }
  func.func @transform_2(%arg0: i32) -> (i32, i32, i32) {
    %c0_i32 = arith.constant 0 : i32
    %c0_i32_0 = arith.constant 0 : i32
    %c0_i32_1 = arith.constant 0 : i32
    %c0_i32_2 = arith.constant 0 : i32
    return %c0_i32, %c0_i32_0, %c0_i32_1 : i32, i32, i32
  }
  func.func @transform_3(%arg0: i32) -> (i32, i32) {
    %c0_i32 = arith.constant 0 : i32
    %c0_i32_0 = arith.constant 0 : i32
    %c0_i32_1 = arith.constant 0 : i32
    return %c0_i32, %c0_i32_0 : i32, i32
  }
  func.func @transform_4(%arg0: i32) -> (i32, i32) {
    %c0_i32 = arith.constant 0 : i32
    %c0_i32_0 = arith.constant 0 : i32
    %c0_i32_1 = arith.constant 0 : i32
    return %c0_i32, %c0_i32_0 : i32, i32
  }
  func.func @transform_5(%arg0: i32) -> (i32, i32) {
    %c0_i32 = arith.constant 0 : i32
    %c0_i32_0 = arith.constant 0 : i32
    return %arg0, %c0_i32 : i32, i32
  }
}

</mosaic_0001>

<bundles_post_ra>
// kernel: tpu_custom_call.1
= control target key start
LH: loop header
LB: loop body
LE: loop exit
PB: predicated region body
PF: predicated region fallthrough
CT: control target
= control target key end

     0   :  { %11 = vsyncpa [#allocation4], 0  ;;  %s378_s0 = inlined_call_operand.hbm [shape: f32[8,32], index: 0, kind: input, shape index: {}]   ;;  %s379_s1 = inlined_call_operand.hbm [shape: f32[8,32], index: 1, kind: input, shape index: {}]   ;;  %s380_s2 = inlined_call_operand.vmem [shape: f32[1,8,32], index: 2, kind: input, shape index: {}]   ;;  %s381_s3 = inlined_call_operand.hbm [shape: f32[32,32], index: 3, kind: input, shape index: {}]   ;;  %s382_s4 = inlined_call_operand.<no memory space> [shape: f32[1,1], index: 4, kind: input, shape index: {}]   ;;  %s383_s5 = inlined_call_operand.vmem [shape: f32[8,3], index: 5, kind: output, shape index: {}]  }
   0x1   :  { %12 = vsyncpa [#allocation6], 0  ;;  %s289_s18 = smov [#allocation5]   ;;  %s290_s20 = smov [#allocation3]  }
   0x2   :  { %s29_s19 = sshll.u32 %s289_s18, 4  ;;  %s19_s21 = sshll.u32 %s290_s20, 4  ;;  %s30_s19 = int_to_ptr.vmem [resolvable:$true] %s29_s19  ;;  %s20_s21 = int_to_ptr.vmem [resolvable:$true] %s19_s21 }
   0x3   :  { %s219_s24 = scalar_lea.hbm %s379_s1, 128 }
   0x4   :  { %p220_p0 = scmp.ne.s32.totalorder %s379_s1, %s219_s24  ;;  %p223_p1 = scmp.lt.u32.totalorder %s219_s24, %s379_s1 }
   0x6   :  { %p225_p2 = pnand %p223_p1, %p220_p0 }
   0x8   :  { %228 = shalt.err (!%p225_p2)
}
   0x9   :  { %s229_s29 = scalar_lea.vmem %s30_s19, 128  ;;  %p234_p4 = scmp.lt.s32.totalorder %s30_s19, %s30_s19 }
   0xa   :  { %p230_p3 = scmp.ne.s32.totalorder %s30_s19, %s229_s29  ;;  %p235_p5 = scmp.lt.s32.totalorder %s229_s29, %s229_s29 }
   0xc   :  { %p236_p6 = por %p235_p5, %p234_p4 }
   0xe   :  { %p237_p7 = pnand %p236_p6, %p230_p3 }
  0x10   :  { %240 = shalt.err (!%p237_p7)
}
  0x11   :  { %32 = dma.hbm_to_vmem [thread:$0]  %s379_s1, 128, %s30_s19, [#allocation6]  }
  0x12   :  { %s241_s9 = scalar_lea.hbm %s378_s0, 128 }
  0x13   :  { %p242_p8 = scmp.ne.s32.totalorder %s378_s0, %s241_s9  ;;  %p245_p9 = scmp.lt.u32.totalorder %s241_s9, %s378_s0 }
  0x15   :  { %p247_p10 = pnand %p245_p9, %p242_p8 }
  0x17   :  { %250 = shalt.err (!%p247_p10)
}
  0x18   :  { %s251_s14 = scalar_lea.vmem %s20_s21, 128  ;;  %p256_p12 = scmp.lt.s32.totalorder %s20_s21, %s20_s21 }
  0x19   :  { %p252_p11 = scmp.ne.s32.totalorder %s20_s21, %s251_s14  ;;  %p257_p13 = scmp.lt.s32.totalorder %s251_s14, %s251_s14 }
  0x1b   :  { %p258_p0 = por %p257_p13, %p256_p12 }
  0x1d   :  { %p259_p1 = pnand %p258_p0, %p252_p11 }
  0x1f   :  { %262 = shalt.err (!%p259_p1)
}
  0x20   :  { %22 = dma.hbm_to_vmem [thread:$0]  %s378_s0, 128, %s20_s21, [#allocation4]  }
  0x21   :  { %s291_s16 = smov [#allocation7]   ;;  %s263_s20 = scalar_lea.hbm %s381_s3, 512 }
  0x22   :  { %s40_s17 = sshll.u32 %s291_s16, 4  ;;  %p264_p2 = scmp.ne.s32.totalorder %s381_s3, %s263_s20  ;;  %s41_s17 = int_to_ptr.vmem [resolvable:$true] %s40_s17 }
  0x23   :  { %p267_p3 = scmp.lt.u32.totalorder %s263_s20, %s381_s3 }
  0x25   :  { %p269_p4 = pnand %p267_p3, %p264_p2 }
  0x27   :  { %272 = shalt.err (!%p269_p4)
}
  0x28   :  { %s273_s26 = scalar_lea.vmem %s41_s17, 512  ;;  %p278_p6 = scmp.lt.s32.totalorder %s41_s17, %s41_s17 }
  0x29   :  { %p274_p5 = scmp.ne.s32.totalorder %s41_s17, %s273_s26  ;;  %p279_p7 = scmp.lt.s32.totalorder %s273_s26, %s273_s26 }
  0x2b   :  { %p280_p8 = por %p279_p7, %p278_p6 }
  0x2d   :  { %p281_p9 = pnand %p280_p8, %p274_p5 }
  0x2f   :  { %284 = shalt.err (!%p281_p9)
}
  0x30   :  { %s292_s0 = smov 128   ;;  %s293_s21 = smov 8  }
  0x31   :  { %46 = dma.hbm_to_vmem [thread:$0]  %s381_s3, 512, %s41_s17, [#allocation6], %s292_s0, %s292_s0, %s293_s21  }
  0x32   :  { %285 = dma.done.wait [#allocation4], 128  }
  0x33   :  { %286 = vsyncadd [#allocation4], 4294967168 }
  0x34   :  { %287 = dma.done.wait [#allocation6], 640  }
  0x35   :  { %288 = vsyncadd [#allocation6], 4294966656  ;;  %v294_v0 = vmov 0.0|0.0   ;;  %vm295_vm0 = vmmov 0   ;;  %v296_v1 = vmov 0.0   ;;  %v64_v2 = vld [vmem:[#allocation7] sm:$0xff]  ;;  %v142_v27 = vlaneseq }
  0x36   :  { %205 = vmatprep.subr.bf16.mxu0 %v294_v0  ;;  %202 = vmatprep.mubr.msk.f32.mxu0 %vm295_vm0, %v296_v1  ;;  %v65_v3 = vld [vmem:[#allocation7 + $0x8] sm:$0xff]  ;;  %v66_v4 = vld [vmem:[#allocation7 + $0x10] sm:$0xff]  ;;  %v67_v6 = vld [vmem:[#allocation7 + $0x18] sm:$0xff]  ;;  %vm68_vm1 = vcmask 261120   ;;  %v148_v33 = vstv %s382_s4  ;;  %vm176_vm4 = vcmask 7168   ;;  %vm178_vm5 = vcmask 15360  }
  0x37   :  { %v206_v5 = vpack.c.bf16 %v65_v3, %v64_v2  ;;  %v209_v7 = vpack.c.bf16 %v67_v6, %v66_v4  ;;  %v58_v8 = vld [vmem:[#allocation3] sm:$0xff]  ;;  %v59_v9 = vld [vmem:[#allocation5] sm:$0xff]  ;;  %v143_v28 = vshrl.u32 %v142_v27, 7  ;;  %vm180_vm6 = vcmask 23552  }
  0x38   :  { %v62_v10 = vld [vmem:[%s380_s2] sm:$0xff]  ;;  %v150_v11 = vrot.slane %v59_v9, 7  ;;  %v163_v13 = vrot.slane %v59_v9, 6 }
  0x39   :  { %207 = vmatpush3.bf16.msra.mxu0 %v206_v5  ;;  %v155_v12 = vrot.slane %v62_v10, 7  ;;  %v168_v18 = vrot.slane %v62_v10, 6  ;;  %vm160_vm2 = vcmp.lt.s32.totalorder %v143_v28, 1  ;;  %vm173_vm3 = vcmp.lt.s32.totalorder %v143_v28, 2 }
  0x3a   :  { %208 = vmatprep.subr.bf16.mxu0 %v294_v0 }
  0x3d   :  { %210 = vmatpush3.bf16.msra.mxu0 %v209_v7 }
  0x40   :  { %203 = vmatmul.mubr.msk.f32.vlgmr.msra.gmra.mrb[0].mxu0 %vm68_vm1, %v58_v8 }
 0x113   :  { %v138_v14 = vpop.f32.mrb[0].mxu0 }
 0x114   :  { %v204_v15 = vpop.f32.mrb[1].mxu0  ;;  %v151_v16 = vmul.f32 %v150_v11, %v138_v14  ;;  %v144_v17 = vmul.f32 %v138_v14, %v59_v9  ;;  %v156_v21 = vmul.f32 %v155_v12, %v138_v14  ;;  %v164_v22 = vmul.f32 %v163_v13, %v138_v14 }
 0x115   :  { %v169_v25 = vmul.f32 %v168_v18, %v138_v14 }
 0x116   :  { %v152_v19 = vsel %vm68_vm1, %v151_v16, 0.0  ;;  %v145_v20 = vsel %vm68_vm1, %v144_v17, 0.0  ;;  %v157_v23 = vsel %vm68_vm1, %v156_v21, 0.0  ;;  %v165_v24 = vsel %vm68_vm1, %v164_v22, 0.0 }
 0x117   :  { %153 = vadd.xlane.f32.xlu0 %v152_v19  ;;  %146 = vadd.xlane.f32.xlu1 %v145_v20  ;;  %v170_v26 = vsel %vm68_vm1, %v169_v25, 0.0 }
 0x11b   :  { %158 = vadd.xlane.f32.xlu0 %v157_v23  ;;  %166 = vadd.xlane.f32.xlu1 %v165_v24 }
 0x11f   :  { %171 = vadd.xlane.f32.xlu0 %v170_v26 }
 0x1a4   :  { %v154_v29 = vpop.xlane.xlu0 %153  ;;  %v147_v30 = vpop.xlane.xlu1 %146 }
 0x1a5   :  { %v149_v37 = vadd.f32 %v148_v33, %v147_v30 }
 0x1a8   :  { %v159_v31 = vpop.xlane.xlu0 %158  ;;  %v167_v35 = vpop.xlane.xlu1 %166 }
 0x1a9   :  { %v161_v32 = vsel %vm160_vm2, %v159_v31, %v154_v29 }
 0x1aa   :  { %v162_v34 = vadd.f32 %v161_v32, %v148_v33 }
 0x1ac   :  { %v172_v36 = vpop.xlane.xlu0 %171  ;;  %v177_v40 = vsel %vm176_vm4, %v149_v37, %v162_v34 }
 0x1ad   :  { %v174_v38 = vsel %vm173_vm3, %v172_v36, %v167_v35 }
 0x1ae   :  { %v175_v39 = vadd.f32 %v174_v38, %v148_v33 }
 0x1b0   :  { %v179_v41 = vsel %vm178_vm5, %v177_v40, %v175_v39 }
 0x1b1   :  { %181 = vst.msk [vmem:[%s383_s5] sm:$0xff] %vm180_vm6, %v179_v41 }
 0x1b2   :  { %186 = vsyncpa [#allocation4], 1 }
 0x1b3   :  { %187 = vsyncpa [#allocation6], 1 }

</bundles_post_ra>
